<compile_context>
chip_gen: v7x
topology: tpu7x:2x2x1
jax: 0.10.0
libtpu: 0.0.40
codegen_flags: <defaults>
</compile_context>

<pallas_src>
import jax
import jax.numpy as jnp
from jax.experimental import pallas as pl
from jax.experimental.pallas import tpu as pltpu


def _round_up(x: int, m: int) -> int:
    return (x + m - 1) // m * m


def _choose_tiles(n: int):
    """Padded N and adjacency tile sizes (TM rows, TK reduction columns)."""
    if n <= 1024:
        n_pad = max(8, _round_up(n, 8))
        return n_pad, n_pad, n_pad          # single tile; block == full array
    n_pad = _round_up(n, 256)
    return n_pad, 256, 256


# ----------------------------------------------------------------------------
# Fused kernel: [GS_block x L] -> Linear -> ReLU -> Linear -> ReLU -> Linear
# Grid: (layer, row-tile, reduction-tile). Activations resident in VMEM scratch.
# ----------------------------------------------------------------------------
def trans_fused_kernel(x_ref, adj_ref, ws_ref, wn_ref,
                       w1_ref, b1_ref, w2_ref, b2_ref, w3_ref, b3_ref,
                       o_ref,
                       h_cur, h_next, neigh_acc, rowsum_acc, inv_ref):
    l = pl.program_id(0)            # GS layer
    i = pl.program_id(1)            # row tile
    k = pl.program_id(2)            # reduction tile (adjacency columns)
    nl = pl.num_programs(0)
    nk = pl.num_programs(2)
    TM, TK = adj_ref.shape

    # First grid step: load x into the resident activation buffer.
    @pl.when((l == 0) & (i == 0) & (k == 0))
    def _():
        h_cur[...] = x_ref[...]

    # Layer boundary: previous layer's output becomes the new input.
    @pl.when((l > 0) & (i == 0) & (k == 0))
    def _():
        h_cur[...] = h_next[...]

    # Start of a row tile's reduction sweep: clear accumulators.
    @pl.when(k == 0)
    def _():
        neigh_acc[...] = jnp.zeros_like(neigh_acc)
        rowsum_acc[...] = jnp.zeros_like(rowsum_acc)

    # Streamed bf16 adjacency tile: accumulate adj @ h over k (f32 accumulation).
    adj_tile = adj_ref[...]                                         # (TM, TK) bf16
    k0 = pl.multiple_of(k * TK, TK)
    h_k = h_cur[pl.ds(k0, TK), :]                                    # (TK, Dp) f32
    neigh_acc[...] += jnp.dot(adj_tile, h_k.astype(jnp.bfloat16),
                              preferred_element_type=jnp.float32)

    # Row sums of the raw adjacency are only needed once (layer 0), in f32.
    @pl.when(l == 0)
    def _():
        rowsum_acc[...] += jnp.sum(adj_tile.astype(jnp.float32), axis=1,
                                   keepdims=True)

    # inv = 1/(rowsum(adj) - 1 + 1e-12) == 1/(rowsum(adj - I) + 1e-12); EUP reciprocal.
    @pl.when((l == 0) & (k == nk - 1))
    def _():
        r0 = pl.multiple_of(i * TM, TM)
        inv_ref[pl.ds(r0, TM), :] = pl.reciprocal(
            rowsum_acc[...] - 1.0 + 1e-12, approx=True)

    # End of reduction sweep: finish this row tile of the current GS layer.
    @pl.when(k == nk - 1)
    def _():
        r0 = pl.multiple_of(i * TM, TM)
        h_tile = h_cur[pl.ds(r0, TM), :]                             # (TM, Dp)
        inv_tile = inv_ref[pl.ds(r0, TM), :]                         # (TM, 1)
        # (adj - I) @ h / rowsum  ==  (adj @ h - h) * inv   (exact algebra)
        neigh = (neigh_acc[...] - h_tile) * inv_tile

        w_self = ws_ref[0]                                           # (Dp, Dp)
        w_neigh = wn_ref[0]
        z = (jnp.dot(h_tile, w_self, preferred_element_type=jnp.float32)
             + jnp.dot(neigh, w_neigh, preferred_element_type=jnp.float32))
        z = jnp.maximum(z, 0.0)
        # F.normalize(z, 2, dim=1) == z * rsqrt(max(sum_sq, 1e-24))
        ssq = jnp.sum(z * z, axis=1, keepdims=True)
        h_next[pl.ds(r0, TM), :] = z * jax.lax.rsqrt(jnp.maximum(ssq, 1e-24))

    # Last layer: run the MLP head on the freshly finished row tile.
    @pl.when((k == nk - 1) & (l == nl - 1))
    def _():
        r0 = pl.multiple_of(i * TM, TM)
        h_fin = h_next[pl.ds(r0, TM), :]
        t = jnp.dot(h_fin, w1_ref[...], preferred_element_type=jnp.float32) + b1_ref[...]
        t = jnp.maximum(t, 0.0)
        t = jnp.dot(t, w2_ref[...], preferred_element_type=jnp.float32) + b2_ref[...]
        t = jnp.maximum(t, 0.0)
        o_ref[...] = (jnp.dot(t, w3_ref[...], preferred_element_type=jnp.float32)
                      + b3_ref[...])


@jax.jit
def trans_forward(X, graph, params):
    """X: (input_dim, cell_num), graph: (cell_num, cell_num) -> (output_dim, cell_num)."""
    in_dim, n = X.shape
    L = params["gs_w_self"].shape[0]
    h2 = params["w1"].shape[1]
    hd = params["w2"].shape[1]
    out_dim = params["w3"].shape[1]
    f32 = jnp.float32

    # Lane-dense padding of the small feature dims.
    Dp = _round_up(in_dim, 128)
    H2p = _round_up(h2, 128)
    Hp = _round_up(hd, 128)
    Op = _round_up(out_dim, 128)
    Np, TM, TK = _choose_tiles(n)

    def pad2(a, r, c):
        return jnp.pad(a.astype(f32), ((0, r - a.shape[0]), (0, c - a.shape[1])))

    x_hat = pad2(X.T, Np, Dp)                                          # (Np, Dp)
    adj = jnp.pad(graph.astype(f32),
                  ((0, Np - n), (0, Np - n))).astype(jnp.bfloat16)     # streamed bf16
    ws = jnp.pad(params["gs_w_self"].astype(f32),
                 ((0, 0), (0, Dp - in_dim), (0, Dp - in_dim)))         # (L, Dp, Dp)
    wn = jnp.pad(params["gs_w_neigh"].astype(f32),
                 ((0, 0), (0, Dp - in_dim), (0, Dp - in_dim)))
    w1 = pad2(params["w1"], Dp, H2p); b1 = pad2(params["b1"], 1, H2p)
    w2 = pad2(params["w2"], H2p, Hp); b2 = pad2(params["b2"], 1, Hp)
    w3 = pad2(params["w3"], Hp, Op);  b3 = pad2(params["b3"], 1, Op)

    grid = (L, Np // TM, Np // TK)

    in_specs = [
        pl.BlockSpec((Np, Dp), lambda l, i, k: (0, 0)),        # x (resident once)
        pl.BlockSpec((TM, TK), lambda l, i, k: (i, k)),        # adjacency (streamed)
        pl.BlockSpec((1, Dp, Dp), lambda l, i, k: (l, 0, 0)),  # W_self of layer l
        pl.BlockSpec((1, Dp, Dp), lambda l, i, k: (l, 0, 0)),  # W_neigh of layer l
        pl.BlockSpec((Dp, H2p), lambda l, i, k: (0, 0)),
        pl.BlockSpec((1, H2p), lambda l, i, k: (0, 0)),
        pl.BlockSpec((H2p, Hp), lambda l, i, k: (0, 0)),
        pl.BlockSpec((1, Hp), lambda l, i, k: (0, 0)),
        pl.BlockSpec((Hp, Op), lambda l, i, k: (0, 0)),
        pl.BlockSpec((1, Op), lambda l, i, k: (0, 0)),
    ]
    out_spec = pl.BlockSpec((TM, Op), lambda l, i, k: (i, 0))
    scratch = [
        pltpu.VMEM((Np, Dp), f32),   # h_cur  (layer input, resident)
        pltpu.VMEM((Np, Dp), f32),   # h_next (layer output, resident)
        pltpu.VMEM((TM, Dp), f32),   # adj @ h accumulator over k tiles
        pltpu.VMEM((TM, 1), f32),    # row-sum accumulator (layer 0 only)
        pltpu.VMEM((Np, 1), f32),    # 1/(rowsum - 1 + eps), computed once
    ]

    flops = (2 * L * Np * Np * Dp                 # adjacency matmuls
             + 2 * 2 * L * Np * Dp * Dp           # self / neighbor matmuls
             + 2 * Np * (Dp * H2p + H2p * Hp + Hp * Op))
    bytes_accessed = (L * Np * Np * 2             # bf16 adjacency, streamed per layer
                      + Np * Dp * 4 + Np * Op * 4
                      + 2 * L * Dp * Dp * 4
                      + (Dp * H2p + H2p * Hp + Hp * Op + H2p + Hp + Op) * 4)
    cost = pl.CostEstimate(flops=flops, transcendentals=(L + 1) * Np,
                           bytes_accessed=bytes_accessed)

    vmem_need = (2 * TM * TK * 2                  # adjacency double buffer (bf16)
                 + 3 * Np * Dp * 4                # x + h_cur + h_next
                 + TM * Dp * 4 + (TM + Np) * 4
                 + 2 * 2 * 2 * Dp * Dp * 4        # per-layer ws/wn, double buffered
                 + (Dp * H2p + H2p * Hp + Hp * Op) * 4
                 + 2 * TM * Op * 4)
    vmem_limit = int(min(max(2 * vmem_need, 32 * 1024 * 1024), 48 * 1024 * 1024))

    y = pl.pallas_call(
        trans_fused_kernel,
        out_shape=jax.ShapeDtypeStruct((Np, Op), f32),
        grid_spec=pltpu.PrefetchScalarGridSpec(
            num_scalar_prefetch=0,
            grid=grid,
            in_specs=in_specs,
            out_specs=out_spec,
            scratch_shapes=scratch),
        compiler_params=pltpu.CompilerParams(
            # TODO(synk): row-tile axis kept "arbitrary" (not megacore-parallel):
            # h_cur/h_next scratch is per-core; v7x 2-TC sharding would need the
            # activations staged in HBM / VMEM_SHARED between layers.
            dimension_semantics=("arbitrary", "arbitrary", "arbitrary"),
            vmem_limit_bytes=vmem_limit),
        cost_estimate=cost,
    )(x_hat, adj, ws, wn, w1, b1, w2, b2, w3, b3)                     # (Np, Op)

    return y[:n, :out_dim].T                                          # (out_dim, n)


# ----------------------------------------------------------------------------
# Parameter init (deterministic, shapes from Trans.__init__)
# ----------------------------------------------------------------------------
def init_params(key, input_dim, output_dim, hidden_dim, gnnlayers):
    keys = jax.random.split(key, gnnlayers + 3)

    ws_self, ws_neigh = [], []
    for i in range(gnnlayers):
        fan_in = 2 * input_dim
        bound = jnp.sqrt(6.0 / fan_in)
        w = jax.random.uniform(keys[i], (2 * input_dim, input_dim),
                               jnp.float32, -bound, bound)
        ws_self.append(w[:input_dim, :])
        ws_neigh.append(w[input_dim:, :])

    params = {
        "gs_w_self": jnp.stack(ws_self),          # (L, D, D)
        "gs_w_neigh": jnp.stack(ws_neigh),        # (L, D, D)
    }

    def linear(k, fan_in, fan_out):
        kw, kb = jax.random.split(k)
        bound = 1.0 / jnp.sqrt(fan_in)
        w = jax.random.uniform(kw, (fan_in, fan_out), jnp.float32, -bound, bound)
        b = jax.random.uniform(kb, (1, fan_out), jnp.float32, -bound, bound)
        return w, b

    params["w1"], params["b1"] = linear(keys[gnnlayers + 0], input_dim, hidden_dim * 2)
    params["w2"], params["b2"] = linear(keys[gnnlayers + 1], hidden_dim * 2, hidden_dim)
    params["w3"], params["b3"] = linear(keys[gnnlayers + 2], hidden_dim, output_dim)
    return params


# ----------------------------------------------------------------------------
# Pure-JAX reference (mirrors the PyTorch forward) for a numerics sanity check
# ----------------------------------------------------------------------------
def trans_forward_ref(X, graph, params):
    x_hat = X.T
    n = graph.shape[0]
    a = graph - jnp.eye(n, dtype=graph.dtype)
    a = a / (jnp.sum(a, axis=1, keepdims=True) + 1e-12)
    for l in range(params["gs_w_self"].shape[0]):
        neigh = a @ x_hat
        comb = x_hat @ params["gs_w_self"][l] + neigh @ params["gs_w_neigh"][l]
        comb = jnp.maximum(comb, 0.0)
        norm = jnp.sqrt(jnp.sum(comb * comb, axis=1, keepdims=True))
        x_hat = comb / jnp.maximum(norm, 1e-12)
    h = jnp.maximum(x_hat @ params["w1"] + params["b1"], 0.0)
    h = jnp.maximum(h @ params["w2"] + params["b2"], 0.0)
    y = h @ params["w3"] + params["b3"]
    return y.T


if __name__ == "__main__":
    input_dim = 16     # n_neighbors / feature dim per cell
    output_dim = 8
    cell_num = 8
    hidden_dim = 32
    gnnlayers = 2

    key = jax.random.PRNGKey(0)
    k_x, k_g, k_p = jax.random.split(key, 3)

    X = jax.random.normal(k_x, (input_dim, cell_num), jnp.float32)
    # positive dense adjacency so (graph - I) row sums are > 0
    graph = jax.random.uniform(k_g, (cell_num, cell_num), jnp.float32, 0.1, 1.0)
    graph = graph + jnp.eye(cell_num, dtype=jnp.float32)

    params = init_params(k_p, input_dim, output_dim, hidden_dim, gnnlayers)

    Y_hat = trans_forward(X, graph, params)
    jax.block_until_ready(Y_hat)
    assert Y_hat.shape == (output_dim, cell_num)

    # The kernel intentionally streams the adjacency in bf16; compare against
    # the f32 reference fed the same bf16-quantized adjacency.
    graph_q = graph.astype(jnp.bfloat16).astype(jnp.float32)
    Y_ref = trans_forward_ref(X, graph_q, params)
    err = float(jnp.max(jnp.abs(Y_hat - Y_ref)))
    assert err < 3e-2, f"max abs error vs reference: {err}"

    print("KERNEL_OK")
</pallas_src>

<mosaic_0001>
module attributes {stable_mosaic.version = 11 : i64} {
  func.func @trans_fused_kernel(%arg0: i32, %arg1: i32, %arg2: i32, %arg3: memref<8x128xf32, #tpu.memory_space<vmem>>, %arg4: memref<8x8xbf16, #tpu.memory_space<vmem>>, %arg5: memref<1x128x128xf32, #tpu.memory_space<vmem>>, %arg6: memref<1x128x128xf32, #tpu.memory_space<vmem>>, %arg7: memref<128x128xf32, #tpu.memory_space<vmem>>, %arg8: memref<1x128xf32, #tpu.memory_space<vmem>>, %arg9: memref<128x128xf32, #tpu.memory_space<vmem>>, %arg10: memref<1x128xf32, #tpu.memory_space<vmem>>, %arg11: memref<128x128xf32, #tpu.memory_space<vmem>>, %arg12: memref<1x128xf32, #tpu.memory_space<vmem>>, %arg13: memref<8x128xf32, #tpu.memory_space<vmem>>, %arg14: memref<8x128xf32, #tpu.memory_space<vmem>>, %arg15: memref<8x128xf32, #tpu.memory_space<vmem>>, %arg16: memref<8x128xf32, #tpu.memory_space<vmem>>, %arg17: memref<8x1xf32, #tpu.memory_space<vmem>>, %arg18: memref<8x1xf32, #tpu.memory_space<vmem>>) attributes {dimension_semantics = [#tpu.dimension_semantics<arbitrary>, #tpu.dimension_semantics<arbitrary>, #tpu.dimension_semantics<arbitrary>], iteration_bounds = array<i64: 2, 1, 1>, scalar_prefetch = 0 : i64, scratch_operands = 5 : i64, tpu.core_type = #tpu.core_type<tc>, window_params = [{pipeline_mode = #tpu.pipeline_mode<synchronous>, transform_indices = @transform_0, window_bounds = array<i64: 8, 128>}, {transform_indices = @transform_1, window_bounds = array<i64: 8, 8>}, {transform_indices = @transform_2, window_bounds = array<i64: 1, 128, 128>}, {transform_indices = @transform_3, window_bounds = array<i64: 1, 128, 128>}, {pipeline_mode = #tpu.pipeline_mode<synchronous>, transform_indices = @transform_4, window_bounds = array<i64: 128, 128>}, {pipeline_mode = #tpu.pipeline_mode<synchronous>, transform_indices = @transform_5, window_bounds = array<i64: 1, 128>}, {pipeline_mode = #tpu.pipeline_mode<synchronous>, transform_indices = @transform_6, window_bounds = array<i64: 128, 128>}, {pipeline_mode = #tpu.pipeline_mode<synchronous>, transform_indices = @transform_7, window_bounds = array<i64: 1, 128>}, {pipeline_mode = #tpu.pipeline_mode<synchronous>, transform_indices = @transform_8, window_bounds = array<i64: 128, 128>}, {pipeline_mode = #tpu.pipeline_mode<synchronous>, transform_indices = @transform_9, window_bounds = array<i64: 1, 128>}, {transform_indices = @transform_10, window_bounds = array<i64: 8, 128>}]} {
    %c0_i32 = arith.constant 0 : i32
    %0 = arith.cmpi eq, %arg0, %c0_i32 : i32
    %c0_i32_0 = arith.constant 0 : i32
    %1 = arith.cmpi eq, %arg1, %c0_i32_0 : i32
    %2 = arith.andi %0, %1 : i1
    %c0_i32_1 = arith.constant 0 : i32
    %3 = arith.cmpi eq, %arg2, %c0_i32_1 : i32
    %4 = arith.andi %2, %3 : i1
    %5 = arith.extui %4 : i1 to i32
    %c0_i32_2 = arith.constant 0 : i32
    %6 = arith.cmpi ne, %5, %c0_i32_2 : i32
    scf.if %6 {
      %c0_24 = arith.constant 0 : index
      %c0_25 = arith.constant 0 : index
      %43 = vector.load %arg3[%c0_24, %c0_25] : memref<8x128xf32, #tpu.memory_space<vmem>>, vector<8x128xf32>
      %c0_26 = arith.constant 0 : index
      %c0_27 = arith.constant 0 : index
      %44 = vector.load %arg14[%c0_26, %c0_27] : memref<8x128xf32, #tpu.memory_space<vmem>>, vector<8x128xf32>
      tpu.vector_store %arg14[%c0_26, %c0_27], %43 {strides = array<i32>} : memref<8x128xf32, #tpu.memory_space<vmem>>, vector<8x128xf32>,
    } else {
    }
    %c0_i32_3 = arith.constant 0 : i32
    %7 = arith.cmpi sgt, %arg0, %c0_i32_3 : i32
    %c0_i32_4 = arith.constant 0 : i32
    %8 = arith.cmpi eq, %arg1, %c0_i32_4 : i32
    %9 = arith.andi %7, %8 : i1
    %c0_i32_5 = arith.constant 0 : i32
    %10 = arith.cmpi eq, %arg2, %c0_i32_5 : i32
    %11 = arith.andi %9, %10 : i1
    %12 = arith.extui %11 : i1 to i32
    %c0_i32_6 = arith.constant 0 : i32
    %13 = arith.cmpi ne, %12, %c0_i32_6 : i32
    scf.if %13 {
      %c0_24 = arith.constant 0 : index
      %c0_25 = arith.constant 0 : index
      %43 = vector.load %arg15[%c0_24, %c0_25] : memref<8x128xf32, #tpu.memory_space<vmem>>, vector<8x128xf32>
      %c0_26 = arith.constant 0 : index
      %c0_27 = arith.constant 0 : index
      %44 = vector.load %arg14[%c0_26, %c0_27] : memref<8x128xf32, #tpu.memory_space<vmem>>, vector<8x128xf32>
      tpu.vector_store %arg14[%c0_26, %c0_27], %43 {strides = array<i32>} : memref<8x128xf32, #tpu.memory_space<vmem>>, vector<8x128xf32>,
    } else {
    }
    %c0_i32_7 = arith.constant 0 : i32
    %14 = arith.cmpi eq, %arg2, %c0_i32_7 : i32
    %15 = arith.extui %14 : i1 to i32
    %c0_i32_8 = arith.constant 0 : i32
    %16 = arith.cmpi ne, %15, %c0_i32_8 : i32
    scf.if %16 {
      %cst_24 = arith.constant 0.000000e+00 : f32
      %43 = vector.broadcast %cst_24 : f32 to vector<8x128xf32>
      %c0_25 = arith.constant 0 : index
      %c0_26 = arith.constant 0 : index
      %44 = vector.load %arg16[%c0_25, %c0_26] : memref<8x128xf32, #tpu.memory_space<vmem>>, vector<8x128xf32>
      tpu.vector_store %arg16[%c0_25, %c0_26], %43 {strides = array<i32>} : memref<8x128xf32, #tpu.memory_space<vmem>>, vector<8x128xf32>,
      %cst_27 = arith.constant 0.000000e+00 : f32
      %45 = vector.broadcast %cst_27 : f32 to vector<8x1xf32>
      %c0_28 = arith.constant 0 : index
      %c0_29 = arith.constant 0 : index
      %46 = vector.load %arg17[%c0_28, %c0_29] : memref<8x1xf32, #tpu.memory_space<vmem>>, vector<8x1xf32>
      tpu.vector_store %arg17[%c0_28, %c0_29], %45 {strides = array<i32>} : memref<8x1xf32, #tpu.memory_space<vmem>>, vector<8x1xf32>,
    } else {
    }
    %c0 = arith.constant 0 : index
    %c0_9 = arith.constant 0 : index
    %17 = vector.load %arg4[%c0, %c0_9] : memref<8x8xbf16, #tpu.memory_space<vmem>>, vector<8x8xbf16>
    %c8_i32 = arith.constant 8 : i32
    %18 = arith.muli %arg2, %c8_i32 : i32
    %19 = tpu.assume_multiple %18, 8 : i32
    %20 = arith.index_cast %19 : i32 to index
    %c0_10 = arith.constant 0 : index
    %21 = vector.load %arg14[%20, %c0_10] : memref<8x128xf32, #tpu.memory_space<vmem>>, vector<8x128xf32>
    %c0_11 = arith.constant 0 : index
    %c0_12 = arith.constant 0 : index
    %22 = vector.load %arg16[%c0_11, %c0_12] : memref<8x128xf32, #tpu.memory_space<vmem>>, vector<8x128xf32>
    %23 = arith.truncf %21 : vector<8x128xf32> to vector<8x128xbf16>
    %cst = arith.constant dense<0.000000e+00> : vector<8x128xf32>
    %24 = tpu.matmul %17, %23, %cst {dimension_numbers = #tpu.dot_dimension_numbers<[1], [0], [0], [1], [0, 0, 1, 1], [], []>} : vector<8x8xbf16>, vector<8x128xbf16>, vector<8x128xf32> -> vector<8x128xf32>
    %25 = arith.addf %22, %24 : vector<8x128xf32>
    %c0_13 = arith.constant 0 : index
    %c0_14 = arith.constant 0 : index
    %26 = vector.load %arg16[%c0_13, %c0_14] : memref<8x128xf32, #tpu.memory_space<vmem>>, vector<8x128xf32>
    tpu.vector_store %arg16[%c0_13, %c0_14], %25 {strides = array<i32>} : memref<8x128xf32, #tpu.memory_space<vmem>>, vector<8x128xf32>,
    %c0_i32_15 = arith.constant 0 : i32
    %27 = arith.cmpi eq, %arg0, %c0_i32_15 : i32
    %28 = arith.extui %27 : i1 to i32
    %c0_i32_16 = arith.constant 0 : i32
    %29 = arith.cmpi ne, %28, %c0_i32_16 : i32
    scf.if %29 {
      %c0_24 = arith.constant 0 : index
      %c0_25 = arith.constant 0 : index
      %43 = vector.load %arg17[%c0_24, %c0_25] : memref<8x1xf32, #tpu.memory_space<vmem>>, vector<8x1xf32>
      %44 = arith.extf %17 : vector<8x8xbf16> to vector<8x8xf32>
      %cst_26 = arith.constant dense<0.000000e+00> : vector<8xf32>
      %45 = vector.multi_reduction <add>, %44, %cst_26 [1] : vector<8x8xf32> to vector<8xf32>
      %46 = vector.shape_cast %45 : vector<8xf32> to vector<8x1xf32>
      %47 = arith.addf %43, %46 : vector<8x1xf32>
      %c0_27 = arith.constant 0 : index
      %c0_28 = arith.constant 0 : index
      %48 = vector.load %arg17[%c0_27, %c0_28] : memref<8x1xf32, #tpu.memory_space<vmem>>, vector<8x1xf32>
      tpu.vector_store %arg17[%c0_27, %c0_28], %47 {strides = array<i32>} : memref<8x1xf32, #tpu.memory_space<vmem>>, vector<8x1xf32>,
    } else {
    }
    %c0_i32_17 = arith.constant 0 : i32
    %30 = arith.cmpi eq, %arg0, %c0_i32_17 : i32
    %c0_i32_18 = arith.constant 0 : i32
    %31 = arith.cmpi eq, %arg2, %c0_i32_18 : i32
    %32 = arith.andi %30, %31 : i1
    %33 = arith.extui %32 : i1 to i32
    %c0_i32_19 = arith.constant 0 : i32
    %34 = arith.cmpi ne, %33, %c0_i32_19 : i32
    scf.if %34 {
      %c8_i32_24 = arith.constant 8 : i32
      %43 = arith.muli %arg1, %c8_i32_24 : i32
      %44 = tpu.assume_multiple %43, 8 : i32
      %c0_25 = arith.constant 0 : index
      %c0_26 = arith.constant 0 : index
      %45 = vector.load %arg17[%c0_25, %c0_26] : memref<8x1xf32, #tpu.memory_space<vmem>>, vector<8x1xf32>
      %cst_27 = arith.constant 1.000000e+00 : f32
      %46 = vector.broadcast %cst_27 : f32 to vector<8x1xf32>
      %47 = arith.subf %45, %46 : vector<8x1xf32>
      %cst_28 = arith.constant 9.99999996E-13 : f32
      %48 = vector.broadcast %cst_28 : f32 to vector<8x1xf32>
      %49 = arith.addf %47, %48 : vector<8x1xf32>
      %50 = tpu.reciprocal %49 {approx = true} : vector<8x1xf32> -> vector<8x1xf32>
      %51 = arith.index_cast %44 : i32 to index
      %c0_29 = arith.constant 0 : index
      %52 = vector.load %arg18[%51, %c0_29] : memref<8x1xf32, #tpu.memory_space<vmem>>, vector<8x1xf32>
      tpu.vector_store %arg18[%51, %c0_29], %50 {strides = array<i32>} : memref<8x1xf32, #tpu.memory_space<vmem>>, vector<8x1xf32>,
    } else {
    }
    %c0_i32_20 = arith.constant 0 : i32
    %35 = arith.cmpi eq, %arg2, %c0_i32_20 : i32
    %36 = arith.extui %35 : i1 to i32
    %c0_i32_21 = arith.constant 0 : i32
    %37 = arith.cmpi ne, %36, %c0_i32_21 : i32
    scf.if %37 {
      %c8_i32_24 = arith.constant 8 : i32
      %43 = arith.muli %arg1, %c8_i32_24 : i32
      %44 = tpu.assume_multiple %43, 8 : i32
      %45 = arith.index_cast %44 : i32 to index
      %c0_25 = arith.constant 0 : index
      %46 = vector.load %arg14[%45, %c0_25] : memref<8x128xf32, #tpu.memory_space<vmem>>, vector<8x128xf32>
      %47 = arith.index_cast %44 : i32 to index
      %c0_26 = arith.constant 0 : index
      %48 = vector.load %arg18[%47, %c0_26] : memref<8x1xf32, #tpu.memory_space<vmem>>, vector<8x1xf32>
      %c0_27 = arith.constant 0 : index
      %c0_28 = arith.constant 0 : index
      %49 = vector.load %arg16[%c0_27, %c0_28] : memref<8x128xf32, #tpu.memory_space<vmem>>, vector<8x128xf32>
      %50 = arith.subf %49, %46 : vector<8x128xf32>
      %51 = vector.broadcast %48 : vector<8x1xf32> to vector<8x128xf32>
      %52 = arith.mulf %50, %51 : vector<8x128xf32>
      %c0_29 = arith.constant 0 : index
      %c0_30 = arith.constant 0 : index
      %c0_31 = arith.constant 0 : index
      %53 = vector.load %arg5[%c0_29, %c0_30, %c0_31] : memref<1x128x128xf32, #tpu.memory_space<vmem>>, vector<1x128x128xf32>
      %54 = vector.shape_cast %53 : vector<1x128x128xf32> to vector<128x128xf32>
      %c0_32 = arith.constant 0 : index
      %c0_33 = arith.constant 0 : index
      %c0_34 = arith.constant 0 : index
      %55 = vector.load %arg6[%c0_32, %c0_33, %c0_34] : memref<1x128x128xf32, #tpu.memory_space<vmem>>, vector<1x128x128xf32>
      %56 = vector.shape_cast %55 : vector<1x128x128xf32> to vector<128x128xf32>
      %cst_35 = arith.constant dense<0.000000e+00> : vector<8x128xf32>
      %57 = tpu.matmul %46, %54, %cst_35 {dimension_numbers = #tpu.dot_dimension_numbers<[1], [0], [0], [1], [0, 0, 1, 1], [], []>} : vector<8x128xf32>, vector<128x128xf32>, vector<8x128xf32> -> vector<8x128xf32>
      %cst_36 = arith.constant dense<0.000000e+00> : vector<8x128xf32>
      %58 = tpu.matmul %52, %56, %cst_36 {dimension_numbers = #tpu.dot_dimension_numbers<[1], [0], [0], [1], [0, 0, 1, 1], [], []>} : vector<8x128xf32>, vector<128x128xf32>, vector<8x128xf32> -> vector<8x128xf32>
      %59 = arith.addf %57, %58 : vector<8x128xf32>
      %cst_37 = arith.constant 0.000000e+00 : f32
      %60 = vector.broadcast %cst_37 : f32 to vector<8x128xf32>
      %61 = arith.maximumf %59, %60 : vector<8x128xf32>
      %62 = arith.mulf %61, %61 : vector<8x128xf32>
      %cst_38 = arith.constant dense<0.000000e+00> : vector<8xf32>
      %63 = vector.multi_reduction <add>, %62, %cst_38 [1] : vector<8x128xf32> to vector<8xf32>
      %64 = vector.shape_cast %63 : vector<8xf32> to vector<8x1xf32>
      %cst_39 = arith.constant 1.000000e-24 : f32
      %65 = vector.broadcast %cst_39 : f32 to vector<8x1xf32>
      %66 = arith.maximumf %64, %65 : vector<8x1xf32>
      %67 = math.rsqrt %66 : vector<8x1xf32>
      %68 = vector.broadcast %67 : vector<8x1xf32> to vector<8x128xf32>
      %69 = arith.mulf %61, %68 : vector<8x128xf32>
      %70 = arith.index_cast %44 : i32 to index
      %c0_40 = arith.constant 0 : index
      %71 = vector.load %arg15[%70, %c0_40] : memref<8x128xf32, #tpu.memory_space<vmem>>, vector<8x128xf32>
      tpu.vector_store %arg15[%70, %c0_40], %69 {strides = array<i32>} : memref<8x128xf32, #tpu.memory_space<vmem>>, vector<8x128xf32>,
    } else {
    }
    %c0_i32_22 = arith.constant 0 : i32
    %38 = arith.cmpi eq, %arg2, %c0_i32_22 : i32
    %c1_i32 = arith.constant 1 : i32
    %39 = arith.cmpi eq, %arg0, %c1_i32 : i32
    %40 = arith.andi %38, %39 : i1
    %41 = arith.extui %40 : i1 to i32
    %c0_i32_23 = arith.constant 0 : i32
    %42 = arith.cmpi ne, %41, %c0_i32_23 : i32
    scf.if %42 {
      %c8_i32_24 = arith.constant 8 : i32
      %43 = arith.muli %arg1, %c8_i32_24 : i32
      %44 = tpu.assume_multiple %43, 8 : i32
      %45 = arith.index_cast %44 : i32 to index
      %c0_25 = arith.constant 0 : index
      %46 = vector.load %arg15[%45, %c0_25] : memref<8x128xf32, #tpu.memory_space<vmem>>, vector<8x128xf32>
      %c0_26 = arith.constant 0 : index
      %c0_27 = arith.constant 0 : index
      %47 = vector.load %arg7[%c0_26, %c0_27] : memref<128x128xf32, #tpu.memory_space<vmem>>, vector<128x128xf32>
      %cst_28 = arith.constant dense<0.000000e+00> : vector<8x128xf32>
      %48 = tpu.matmul %46, %47, %cst_28 {dimension_numbers = #tpu.dot_dimension_numbers<[1], [0], [0], [1], [0, 0, 1, 1], [], []>} : vector<8x128xf32>, vector<128x128xf32>, vector<8x128xf32> -> vector<8x128xf32>
      %c0_29 = arith.constant 0 : index
      %c0_30 = arith.constant 0 : index
      %49 = vector.load %arg8[%c0_29, %c0_30] : memref<1x128xf32, #tpu.memory_space<vmem>>, vector<1x128xf32>
      %50 = vector.broadcast %49 : vector<1x128xf32> to vector<8x128xf32>
      %51 = arith.addf %48, %50 : vector<8x128xf32>
      %cst_31 = arith.constant 0.000000e+00 : f32
      %52 = vector.broadcast %cst_31 : f32 to vector<8x128xf32>
      %53 = arith.maximumf %51, %52 : vector<8x128xf32>
      %c0_32 = arith.constant 0 : index
      %c0_33 = arith.constant 0 : index
      %54 = vector.load %arg9[%c0_32, %c0_33] : memref<128x128xf32, #tpu.memory_space<vmem>>, vector<128x128xf32>
      %cst_34 = arith.constant dense<0.000000e+00> : vector<8x128xf32>
      %55 = tpu.matmul %53, %54, %cst_34 {dimension_numbers = #tpu.dot_dimension_numbers<[1], [0], [0], [1], [0, 0, 1, 1], [], []>} : vector<8x128xf32>, vector<128x128xf32>, vector<8x128xf32> -> vector<8x128xf32>
      %c0_35 = arith.constant 0 : index
      %c0_36 = arith.constant 0 : index
      %56 = vector.load %arg10[%c0_35, %c0_36] : memref<1x128xf32, #tpu.memory_space<vmem>>, vector<1x128xf32>
      %57 = vector.broadcast %56 : vector<1x128xf32> to vector<8x128xf32>
      %58 = arith.addf %55, %57 : vector<8x128xf32>
      %cst_37 = arith.constant 0.000000e+00 : f32
      %59 = vector.broadcast %cst_37 : f32 to vector<8x128xf32>
      %60 = arith.maximumf %58, %59 : vector<8x128xf32>
      %c0_38 = arith.constant 0 : index
      %c0_39 = arith.constant 0 : index
      %61 = vector.load %arg11[%c0_38, %c0_39] : memref<128x128xf32, #tpu.memory_space<vmem>>, vector<128x128xf32>
      %cst_40 = arith.constant dense<0.000000e+00> : vector<8x128xf32>
      %62 = tpu.matmul %60, %61, %cst_40 {dimension_numbers = #tpu.dot_dimension_numbers<[1], [0], [0], [1], [0, 0, 1, 1], [], []>} : vector<8x128xf32>, vector<128x128xf32>, vector<8x128xf32> -> vector<8x128xf32>
      %c0_41 = arith.constant 0 : index
      %c0_42 = arith.constant 0 : index
      %63 = vector.load %arg12[%c0_41, %c0_42] : memref<1x128xf32, #tpu.memory_space<vmem>>, vector<1x128xf32>
      %64 = vector.broadcast %63 : vector<1x128xf32> to vector<8x128xf32>
      %65 = arith.addf %62, %64 : vector<8x128xf32>
      %c0_43 = arith.constant 0 : index
      %c0_44 = arith.constant 0 : index
      %66 = vector.load %arg13[%c0_43, %c0_44] : memref<8x128xf32, #tpu.memory_space<vmem>>, vector<8x128xf32>
      tpu.vector_store %arg13[%c0_43, %c0_44], %65 {strides = array<i32>} : memref<8x128xf32, #tpu.memory_space<vmem>>, vector<8x128xf32>,
    } else {
    }
    return
  }
  func.func @transform_0(%arg0: i32, %arg1: i32, %arg2: i32) -> (i32, i32) {
    %c0_i32 = arith.constant 0 : i32
    %c0_i32_0 = arith.constant 0 : i32
    %c0_i32_1 = arith.constant 0 : i32
    return %c0_i32, %c0_i32_0 : i32, i32
  }
  func.func @transform_1(%arg0: i32, %arg1: i32, %arg2: i32) -> (i32, i32) {
    %c0_i32 = arith.constant 0 : i32
    return %arg1, %arg2 : i32, i32
  }
  func.func @transform_2(%arg0: i32, %arg1: i32, %arg2: i32) -> (i32, i32, i32) {
    %c0_i32 = arith.constant 0 : i32
    %c0_i32_0 = arith.constant 0 : i32
    %c0_i32_1 = arith.constant 0 : i32
    return %arg0, %c0_i32, %c0_i32_0 : i32, i32, i32
  }
  func.func @transform_3(%arg0: i32, %arg1: i32, %arg2: i32) -> (i32, i32, i32) {
    %c0_i32 = arith.constant 0 : i32
    %c0_i32_0 = arith.constant 0 : i32
    %c0_i32_1 = arith.constant 0 : i32
    return %arg0, %c0_i32, %c0_i32_0 : i32, i32, i32
  }
  func.func @transform_4(%arg0: i32, %arg1: i32, %arg2: i32) -> (i32, i32) {
    %c0_i32 = arith.constant 0 : i32
    %c0_i32_0 = arith.constant 0 : i32
    %c0_i32_1 = arith.constant 0 : i32
    return %c0_i32, %c0_i32_0 : i32, i32
  }
  func.func @transform_5(%arg0: i32, %arg1: i32, %arg2: i32) -> (i32, i32) {
    %c0_i32 = arith.constant 0 : i32
    %c0_i32_0 = arith.constant 0 : i32
    %c0_i32_1 = arith.constant 0 : i32
    return %c0_i32, %c0_i32_0 : i32, i32
  }
  func.func @transform_6(%arg0: i32, %arg1: i32, %arg2: i32) -> (i32, i32) {
    %c0_i32 = arith.constant 0 : i32
    %c0_i32_0 = arith.constant 0 : i32
    %c0_i32_1 = arith.constant 0 : i32
    return %c0_i32, %c0_i32_0 : i32, i32
  }
  func.func @transform_7(%arg0: i32, %arg1: i32, %arg2: i32) -> (i32, i32) {
    %c0_i32 = arith.constant 0 : i32
    %c0_i32_0 = arith.constant 0 : i32
    %c0_i32_1 = arith.constant 0 : i32
    return %c0_i32, %c0_i32_0 : i32, i32
  }
  func.func @transform_8(%arg0: i32, %arg1: i32, %arg2: i32) -> (i32, i32) {
    %c0_i32 = arith.constant 0 : i32
    %c0_i32_0 = arith.constant 0 : i32
    %c0_i32_1 = arith.constant 0 : i32
    return %c0_i32, %c0_i32_0 : i32, i32
  }
  func.func @transform_9(%arg0: i32, %arg1: i32, %arg2: i32) -> (i32, i32) {
    %c0_i32 = arith.constant 0 : i32
    %c0_i32_0 = arith.constant 0 : i32
    %c0_i32_1 = arith.constant 0 : i32
    return %c0_i32, %c0_i32_0 : i32, i32
  }
  func.func @transform_10(%arg0: i32, %arg1: i32, %arg2: i32) -> (i32, i32) {
    %c0_i32 = arith.constant 0 : i32
    %c0_i32_0 = arith.constant 0 : i32
    return %arg1, %c0_i32 : i32, i32
  }
}

</mosaic_0001>

<bundles_post_ra>
// kernel: trans_forward.1
= control target key start
LH: loop header
LB: loop body
LE: loop exit
PB: predicated region body
PF: predicated region fallthrough
CT: control target
= control target key end

     0   :  { %s1665_s13 = smov 0   ;;  %s1667_s14 = smov 0   ;;  %s1960_s0 = inlined_call_operand.vmem [shape: f32[8,128], index: 0, kind: input, shape index: {}]   ;;  %s1961_s1 = inlined_call_operand.vmem [shape: bf16[8,8], index: 1, kind: input, shape index: {}]   ;;  %s1962_s2 = inlined_call_operand.vmem [shape: f32[2,128,128], index: 2, kind: input, shape index: {}]   ;;  %s1963_s3 = inlined_call_operand.vmem [shape: f32[2,128,128], index: 3, kind: input, shape index: {}]   ;;  %s1964_s4 = inlined_call_operand.vmem [shape: f32[128,128], index: 4, kind: input, shape index: {}]   ;;  %s1965_s5 = inlined_call_operand.vmem [shape: f32[1,128], index: 5, kind: input, shape index: {}]   ;;  %s1966_s6 = inlined_call_operand.vmem [shape: f32[128,128], index: 6, kind: input, shape index: {}]   ;;  %s1967_s7 = inlined_call_operand.vmem [shape: f32[1,128], index: 7, kind: input, shape index: {}]   ;;  %s1968_s8 = inlined_call_operand.vmem [shape: f32[128,128], index: 8, kind: input, shape index: {}]   ;;  %s1969_s9 = inlined_call_operand.vmem [shape: f32[1,128], index: 9, kind: input, shape index: {}]   ;;  %s1970_s10 = inlined_call_operand.vmem [shape: f32[8,128], index: 10, kind: output, shape index: {}]  }
   0x1   :  { %s1669_s15 = smov 0  }
   0x2 LB: > { %s39_s16 = sadd.s32 1, %s1597_s14  ;;  %p1126_p0 = scmp.ge.s32.totalorder %s1601_s15, 1  ;;  %s1601_s15 = sphi %s1669_s15, %s20_s15   ;;  %s1597_s14 = sphi %s1667_s14, %s1972_s14   ;;  %s1593_s13 = sphi %s1665_s13, %s1971_s13  }
   0x3   : > { %p41_p1 = scmp.ge.s32.totalorder %s39_s16, 2  ;;  %p355_p2 = scmp.lt.s32.totalorder %s1601_s15, 3 }
   0x5   : > { %s1974_s16 = smov (%p41_p1, %s39_s16), 0  ;;  %p356_p3 = pnand %p1126_p0, %p355_p2 }
   0x6   : > { %p411_p4 = scmp.lt.s32.totalorder (!%p356_p3), %s1593_s13, 1  ;;  %p426_p5 = scmp.eq.s32.totalorder (!%p356_p3), %s1593_s13, 0 }
   0x7   : > { %359 = sbr.rel (%p356_p3) target bundleno = 1437 (0x59d), region = 60 }
   0xe   : > { %s412_s17 = scalar_select %p411_p4, %s1593_s13, 1 }
   0xf   : > { %434 = sbr.rel (!%p426_p5) target bundleno = 22 (0x16), region = 64  ;;  %v435_v0 = vld [vmem:[%s1960_s0] sm:$0xff] (%p426_p5) }
  0x10   : > { %s1146_s18 = sshll.u32 %s412_s17, 7  ;;  %436 = vst [vmem:[#allocation2] sm:$0xff] (%p426_p5), %v435_v0 }
  0x11   : > { %s1691_s21 = scalar_lea.vmem %s1962_s2, %s1146_s18  ;;  %s1696_s24 = scalar_lea.vmem %s1963_s3, %s1146_s18 }
  0x16 PF: > { %p437_p6 = scmp.gt.s32.totalorder %s1593_s13, 0 }
  0x17   : > { %v444_v1 = vld [vmem:[#allocation3] sm:$0xff] (%p437_p6) }
  0x18   : > { %443 = sbr.rel (!%p437_p6) target bundleno = 31 (0x1f), region = 68  ;;  %445 = vst [vmem:[#allocation2] sm:$0xff] (%p437_p6), %v444_v1 }
  0x1f PF: > { %vm450_vm0 = vcmask 7168   ;;  %v455_v2 = vld [vmem:[#allocation2] sm:$0xff]  ;;  %vm462_vm1 = vcmask 1043456   ;;  %v1603_v3 = vmov 0.0   ;;  %vm1604_vm2 = vmmov 0   ;;  %p1136_p7 = scmp.ne.s32.totalorder %s1593_s13, 0 }
  0x20   : > { %451 = vst.msk [vmem:[#allocation5] sm:$0xff] %vm450_vm0, %v1603_v3  ;;  %1241 = vmatprep.subr.bf16.mxu0 %v1603_v3  ;;  %v457_v4 = vpack.c.bf16 %v455_v2, %v455_v2  ;;  %1243 = vmatprep.mubr.msk.bf16.mxu0 %vm1604_vm2, %v1603_v3  ;;  %v452_v6 = vld [vmem:[%s1961_s1] sm:$0xf]  ;;  %vm458_vm3 = vcmask 64512  }
  0x21   : > { %v512_v11 = vunpack.c.l.bf16 (!%p1136_p7), %v452_v6 }
  0x22   : > { %v464_v5 = vsel %vm462_vm1, %v457_v4, 0 }
  0x23   : > { %1242 = vmatpush3.bf16.msra.mxu0 %v464_v5  ;;  %v513_v12 = vsel (!%p1136_p7), %vm458_vm3, %v512_v11, 0.0 }
  0x24   : > { %514 = vadd.xlane.f32.xlu0 (!%p1136_p7), %v513_v12 }
  0x26   : > { %1244 = vmatmul.mubr.msk.bf16.vlgmr.msra.gmra.mrb[0].mxu0 %vm458_vm3, %v452_v6 }
  0x27   : > { %v511_v13 = vld [vmem:[#allocation5] sm:$0xff] (!%p1136_p7) }
  0xb1   : > { %v515_v14 = vpop.xlane.xlu0 (!%p1136_p7), %514 }
  0xb2   : > { %v516_v15 = vadd.f32 (!%p1136_p7), %v515_v14, %v511_v13 }
  0xb4   : > { %518 = vst.msk [vmem:[#allocation5] sm:$0xff] (!%p1136_p7), %vm450_vm0, %v516_v15 }
  0xf6   : > { %510 = sbr.rel (%p1136_p7) target bundleno = 253 (0xfd), region = 76 }
  0xf9   : > { %v500_v7 = vpop.f32.mrb[0].mxu0 }
  0xfa   : > { %v1245_v8 = vpop.f32.mrb[1].mxu0  ;;  %507 = vst [vmem:[#allocation4] sm:$0xff] %v500_v7 }
  0xfb   : > { %v503_v9 = vpop.f32.mrb[2].mxu0 }
  0xfc   : > { %v1246_v10 = vpop.f32.mrb[3].mxu0 }
  0xfd PF: > { %522 = sbr.rel (!%p426_p5) target bundleno = 270 (0x10e), region = 80  ;;  %v524_v16 = vld [vmem:[#allocation5] sm:$0xff] (%p426_p5) }
  0xfe   : > { %v1138_v17 = vadd.f32 (%p426_p5), -1.0, %v524_v16 }
 0x100   : > { %v526_v18 = vadd.f32 (%p426_p5), 1e-12, %v1138_v17 }
 0x102   : > { %1574 = vrcp.f32 (%p426_p5), %v526_v18 }
 0x10c   : > { %v1575_v19 = vpop.eup %1574 }
 0x10d   : > { %530 = vst.msk [vmem:[#allocation6] sm:$0xff] %vm450_vm0, %v1575_v19 }
 0x10e PF: > { %v547_v21 = vld [vmem:[%s1691_s21] sm:$0xff]  ;;  %v548_v22 = vld [vmem:[%s1691_s21 + $0x8] sm:$0xff]  ;;  %1314 = vmatprep.mubr.msk.f32.mxu1 %vm1604_vm2, %v1603_v3  ;;  %1279 = vmatprep.mubr.msk.f32.mxu0 %vm1604_vm2, %v1603_v3  ;;  %v1605_v23 = vmov 0   ;;  %v1606_v24 = vmov 0.0|0.0   ;;  %v549_v28 = vld [vmem:[%s1691_s21 + $0x10] sm:$0xff]  ;;  %p728_p8 = scmp.eq.s32.totalorder %s1593_s13, 1 }
 0x10f   : > { %1576 = vset.pattern.permute.xlu0 %v1605_v23  ;;  %1446 = vmatprep.subr.bf16.mxu1 %v1606_v24  ;;  %v1447_v25 = vpack.c.bf16 %v548_v22, %v547_v21  ;;  %v563_v26 = vld [vmem:[%s1696_s24] sm:$0xff]  ;;  %v564_v27 = vld [vmem:[%s1696_s24 + $0x8] sm:$0xff]  ;;  %v550_v30 = vld [vmem:[%s1691_s21 + $0x18] sm:$0xff]  ;;  %vm1608_vm4 = vmmov (%p728_p8), 0  }
 0x110   : > { %1422 = vmatprep.subr.bf16.mxu0 %v1606_v24  ;;  %v1423_v29 = vpack.c.bf16 %v564_v27, %v563_v26  ;;  %v565_v31 = vld [vmem:[%s1696_s24 + $0x10] sm:$0xff]  ;;  %v566_v32 = vld [vmem:[%s1696_s24 + $0x18] sm:$0xff]  ;;  %v1450_v33 = vpack.c.bf16 %v550_v30, %v549_v28  ;;  %v551_v35 = vld [vmem:[%s1691_s21 + $0x20] sm:$0xff]  ;;  %v1607_v26 = vmov (%p728_p8), 0.0|0.0  }
 0x111   : > { %1448 = vmatpush3.bf16.msra.mxu1 %v1447_v25  ;;  %v1426_v34 = vpack.c.bf16 %v566_v32, %v565_v31  ;;  %v552_v36 = vld [vmem:[%s1691_s21 + $0x28] sm:$0xff]  ;;  %v567_v37 = vld [vmem:[%s1696_s24 + $0x20] sm:$0xff]  ;;  %v553_v41 = vld [vmem:[%s1691_s21 + $0x30] sm:$0xff] }
 0x112   : > { %1424 = vmatpush3.bf16.msra.mxu0 %v1423_v29  ;;  %1449 = vmatprep.subr.bf16.mxu1 %v1606_v24  ;;  %v568_v38 = vld [vmem:[%s1696_s24 + $0x28] sm:$0xff]  ;;  %v1453_v39 = vpack.c.bf16 %v552_v36, %v551_v35  ;;  %v554_v42 = vld [vmem:[%s1691_s21 + $0x38] sm:$0xff]  ;;  %v569_v43 = vld [vmem:[%s1696_s24 + $0x30] sm:$0xff]  ;;  %v1609_v29 = vmov (%p728_p8), 0.0  }
 0x113   : > { %1425 = vmatprep.subr.bf16.mxu0 %v1606_v24  ;;  %v1429_v40 = vpack.c.bf16 %v568_v38, %v567_v37  ;;  %v570_v44 = vld [vmem:[%s1696_s24 + $0x38] sm:$0xff]  ;;  %v1456_v45 = vpack.c.bf16 %v554_v42, %v553_v41  ;;  %v555_v47 = vld [vmem:[%s1691_s21 + $0x40] sm:$0xff]  ;;  %v556_v48 = vld [vmem:[%s1691_s21 + $0x48] sm:$0xff] }
 0x114   : > { %v538_v20 = vld [vmem:[#allocation6] sm:$0xff]  ;;  %v1432_v46 = vpack.c.bf16 %v570_v44, %v569_v43  ;;  %v572_v50 = vld [vmem:[%s1696_s24 + $0x48] sm:$0xff]  ;;  %v1459_v51 = vpack.c.bf16 %v556_v48, %v555_v47  ;;  %v557_v53 = vld [vmem:[%s1691_s21 + $0x50] sm:$0xff] }
 0x115   : > { %543 = vperm.xlu0 %1576, %v538_v20   ;;  %1451 = vmatpush3.bf16.msra.mxu1 %v1450_v33  ;;  %v571_v49 = vld [vmem:[%s1696_s24 + $0x40] sm:$0xff]  ;;  %v558_v54 = vld [vmem:[%s1691_s21 + $0x58] sm:$0xff]  ;;  %v573_v55 = vld [vmem:[%s1696_s24 + $0x50] sm:$0xff] }
 0x116   : > { %1427 = vmatpush3.bf16.msra.mxu0 %v1426_v34  ;;  %1452 = vmatprep.subr.bf16.mxu1 %v1606_v24  ;;  %v1435_v52 = vpack.c.bf16 %v572_v50, %v571_v49  ;;  %v574_v56 = vld [vmem:[%s1696_s24 + $0x58] sm:$0xff]  ;;  %v1462_v57 = vpack.c.bf16 %v558_v54, %v557_v53  ;;  %v559_v59 = vld [vmem:[%s1691_s21 + $0x60] sm:$0xff]  ;;  %v560_v60 = vld [vmem:[%s1691_s21 + $0x68] sm:$0xff] }
 0x117   : > { %1428 = vmatprep.subr.bf16.mxu0 %v1606_v24  ;;  %v1438_v58 = vpack.c.bf16 %v574_v56, %v573_v55  ;;  %v575_v61 = vld [vmem:[%s1696_s24 + $0x60] sm:$0xff]  ;;  %v576_v62 = vld [vmem:[%s1696_s24 + $0x68] sm:$0xff]  ;;  %v1465_v63 = vpack.c.bf16 %v560_v60, %v559_v59  ;;  %v561_v1 = vld [vmem:[%s1691_s21 + $0x70] sm:$0xff] }
 0x118   : > { %v1441_v0 = vpack.c.bf16 %v576_v62, %v575_v61  ;;  %v562_v2 = vld [vmem:[%s1691_s21 + $0x78] sm:$0xff]  ;;  %v577_v3 = vld [vmem:[%s1696_s24 + $0x70] sm:$0xff]  ;;  %v536_v7 = vld [vmem:[#allocation2] sm:$0xff] }
 0x119   : > { %1454 = vmatpush3.bf16.msra.mxu1 %v1453_v39  ;;  %v578_v4 = vld [vmem:[%s1696_s24 + $0x78] sm:$0xff]  ;;  %v1468_v5 = vpack.c.bf16 %v562_v2, %v561_v1  ;;  %v539_v8 = vld [vmem:[#allocation4] sm:$0xff]  ;;  %v736_v23 = vld [vmem:[%s1964_s4] sm:$0xff] (%p728_p8) }
 0x11a   : > { %1430 = vmatpush3.bf16.msra.mxu0 %v1429_v40  ;;  %1455 = vmatprep.subr.bf16.mxu1 %v1606_v24  ;;  %v1444_v6 = vpack.c.bf16 %v578_v4, %v577_v3  ;;  %v540_v9 = vsub.f32 %v539_v8, %v536_v7  ;;  %v738_v25 = vld [vmem:[%s1964_s4 + $0x10] sm:$0xff] (%p728_p8)  ;;  %v739_v28 = vld [vmem:[%s1964_s4 + $0x18] sm:$0xff] (%p728_p8)  ;;  %v740_v31 = vld [vmem:[%s1964_s4 + $0x20] sm:$0xff] (%p728_p8) }
 0x11b   : > { %1431 = vmatprep.subr.bf16.mxu0 %v1606_v24  ;;  %v1474_v30 = vpack.c.bf16 (%p728_p8), %v739_v28, %v738_v25  ;;  %v741_v32 = vld [vmem:[%s1964_s4 + $0x28] sm:$0xff] (%p728_p8)  ;;  %v830_v33 = vld [vmem:[%s1966_s6] sm:$0xff] (%p728_p8)  ;;  %v832_v35 = vld [vmem:[%s1966_s6 + $0x10] sm:$0xff] (%p728_p8) }
 0x11c   : > { %v831_v34 = vld [vmem:[%s1966_s6 + $0x8] sm:$0xff] (%p728_p8)  ;;  %v833_v36 = vld [vmem:[%s1966_s6 + $0x18] sm:$0xff] (%p728_p8)  ;;  %v1477_v37 = vpack.c.bf16 (%p728_p8), %v741_v32, %v740_v31  ;;  %v742_v39 = vld [vmem:[%s1964_s4 + $0x30] sm:$0xff] (%p728_p8) }
 0x11d   : > { %1457 = vmatpush3.bf16.msra.mxu1 %v1456_v45  ;;  %v1495_v38 = vpack.c.bf16 (%p728_p8), %v831_v34, %v830_v33  ;;  %v743_v40 = vld [vmem:[%s1964_s4 + $0x38] sm:$0xff] (%p728_p8)  ;;  %v1498_v41 = vpack.c.bf16 (%p728_p8), %v833_v36, %v832_v35  ;;  %v834_v42 = vld [vmem:[%s1966_s6 + $0x20] sm:$0xff] (%p728_p8)  ;;  %v835_v43 = vld [vmem:[%s1966_s6 + $0x28] sm:$0xff] (%p728_p8) }
 0x11e   : > { %1433 = vmatpush3.bf16.msra.mxu0 %v1432_v46  ;;  %1458 = vmatprep.subr.bf16.mxu1 %v1606_v24  ;;  %v1480_v44 = vpack.c.bf16 (%p728_p8), %v743_v40, %v742_v39  ;;  %v744_v45 = vld [vmem:[%s1964_s4 + $0x40] sm:$0xff] (%p728_p8)  ;;  %v745_v46 = vld [vmem:[%s1964_s4 + $0x48] sm:$0xff] (%p728_p8)  ;;  %v1501_v47 = vpack.c.bf16 (%p728_p8), %v835_v43, %v834_v42  ;;  %v836_v48 = vld [vmem:[%s1966_s6 + $0x30] sm:$0xff] (%p728_p8) }
 0x11f   : > { %1434 = vmatprep.subr.bf16.mxu0 %v1606_v24  ;;  %v837_v49 = vld [vmem:[%s1966_s6 + $0x38] sm:$0xff] (%p728_p8)  ;;  %v1483_v50 = vpack.c.bf16 (%p728_p8), %v745_v46, %v744_v45  ;;  %v838_v54 = vld [vmem:[%s1966_s6 + $0x40] sm:$0xff] (%p728_p8)  ;;  %v839_v55 = vld [vmem:[%s1966_s6 + $0x48] sm:$0xff] (%p728_p8) }
 0x120   : > { %v1504_v53 = vpack.c.bf16 (%p728_p8), %v837_v49, %v836_v48  ;;  %v1507_v59 = vpack.c.bf16 (%p728_p8), %v839_v55, %v838_v54  ;;  %v840_v60 = vld [vmem:[%s1966_s6 + $0x50] sm:$0xff] (%p728_p8)  ;;  %v841_v61 = vld [vmem:[%s1966_s6 + $0x58] sm:$0xff] (%p728_p8)  ;;  %v842_v2 = vld [vmem:[%s1966_s6 + $0x60] sm:$0xff] (%p728_p8) }
 0x121   : > { %1460 = vmatpush3.bf16.msra.mxu1 %v1459_v51  ;;  %v746_v51 = vld [vmem:[%s1964_s4 + $0x50] sm:$0xff] (%p728_p8)  ;;  %v1510_v1 = vpack.c.bf16 (%p728_p8), %v841_v61, %v840_v60  ;;  %v843_v3 = vld [vmem:[%s1966_s6 + $0x68] sm:$0xff] (%p728_p8)  ;;  %v845_v8 = vld [vmem:[%s1966_s6 + $0x78] sm:$0xff] (%p728_p8) }
 0x122   : > { %1436 = vmatpush3.bf16.msra.mxu0 %v1435_v52  ;;  %1461 = vmatprep.subr.bf16.mxu1 %v1606_v24  ;;  %v747_v52 = vld [vmem:[%s1964_s4 + $0x58] sm:$0xff] (%p728_p8)  ;;  %v934_v25 = vld [vmem:[%s1968_s8 + $0x50] sm:$0xff] (%p728_p8)  ;;  %v1140_v32 = vld [vmem:[%s1965_s5] ss:$0 sm:$0xff] (%p728_p8) }
 0x123   : > { %1437 = vmatprep.subr.bf16.mxu0 %v1606_v24  ;;  %v1486_v56 = vpack.c.bf16 (%p728_p8), %v747_v52, %v746_v51 }
 0x125   : > { %1463 = vmatpush3.bf16.msra.mxu1 %v1462_v57  ;;  %v748_v57 = vld [vmem:[%s1964_s4 + $0x60] sm:$0xff] (%p728_p8) }
 0x126   : > { %1439 = vmatpush3.bf16.msra.mxu0 %v1438_v58  ;;  %1464 = vmatprep.subr.bf16.mxu1 %v1606_v24  ;;  %v749_v58 = vld [vmem:[%s1964_s4 + $0x68] sm:$0xff] (%p728_p8) }
 0x127   : > { %1440 = vmatprep.subr.bf16.mxu0 %v1606_v24  ;;  %v1489_v62 = vpack.c.bf16 (%p728_p8), %v749_v58, %v748_v57 }
 0x129   : > { %1466 = vmatpush3.bf16.msra.mxu1 %v1465_v63  ;;  %v750_v63 = vld [vmem:[%s1964_s4 + $0x70] sm:$0xff] (%p728_p8) }
 0x12a   : > { %1442 = vmatpush3.bf16.msra.mxu0 %v1441_v0  ;;  %1467 = vmatprep.subr.bf16.mxu1 %v1606_v24  ;;  %v751_v0 = vld [vmem:[%s1964_s4 + $0x78] sm:$0xff] (%p728_p8) }
 0x12b   : > { %1443 = vmatprep.subr.bf16.mxu0 %v1606_v24  ;;  %v737_v24 = vld [vmem:[%s1964_s4 + $0x8] sm:$0xff] (%p728_p8)  ;;  %v1492_v4 = vpack.c.bf16 (%p728_p8), %v751_v0, %v750_v63 }
 0x12c   : > { %v1471_v27 = vpack.c.bf16 (%p728_p8), %v737_v24, %v736_v23  ;;  %v933_v23 = vld [vmem:[%s1968_s8 + $0x48] sm:$0xff] (%p728_p8) }
 0x12d   : > { %1469 = vmatpush3.bf16.msra.mxu1 %v1468_v5  ;;  %v1513_v5 = vpack.c.bf16 (%p728_p8), %v843_v3, %v842_v2 }
 0x12e   : > { %1445 = vmatpush3.bf16.msra.mxu0 %v1444_v6  ;;  %1494 = vmatprep.subr.bf16.mxu1 (%p728_p8), %v1607_v26 }
 0x12f   : > { %1470 = vmatprep.subr.bf16.mxu0 (%p728_p8), %v1607_v26 }
 0x130   : > { %1315 = vmatmul.mubr.f32.vlgmr.msra.gmra.mrb[0].mxu1 %v536_v7  ;;  %v844_v7 = vld [vmem:[%s1966_s6 + $0x70] sm:$0xff] (%p728_p8) }
 0x131   : > { %1384 = vmatprep.mubr.msk.f32.mxu1 (%p728_p8), %vm1608_vm4, %v1609_v29  ;;  %1496 = vmatpush3.bf16.msra.mxu1 (%p728_p8), %v1495_v38  ;;  %v939_v38 = vld [vmem:[%s1968_s8 + $0x78] sm:$0xff] (%p728_p8) }
 0x132   : > { %1497 = vmatprep.subr.bf16.mxu1 (%p728_p8), %v1607_v26 }
 0x135   : > { %1499 = vmatpush3.bf16.msra.mxu1 (%p728_p8), %v1498_v41 }
 0x136   : > { %1500 = vmatprep.subr.bf16.mxu1 (%p728_p8), %v1607_v26 }
 0x139   : > { %1502 = vmatpush3.bf16.msra.mxu1 (%p728_p8), %v1501_v47 }
 0x13a   : > { %1503 = vmatprep.subr.bf16.mxu1 (%p728_p8), %v1607_v26 }
 0x13d   : > { %1505 = vmatpush3.bf16.msra.mxu1 (%p728_p8), %v1504_v53 }
 0x13e   : > { %1506 = vmatprep.subr.bf16.mxu1 (%p728_p8), %v1607_v26 }
 0x141   : > { %1508 = vmatpush3.bf16.msra.mxu1 (%p728_p8), %v1507_v59 }
 0x142   : > { %1509 = vmatprep.subr.bf16.mxu1 (%p728_p8), %v1607_v26 }
 0x145   : > { %1511 = vmatpush3.bf16.msra.mxu1 (%p728_p8), %v1510_v1 }
 0x146   : > { %1512 = vmatprep.subr.bf16.mxu1 (%p728_p8), %v1607_v26 }
 0x149   : > { %1514 = vmatpush3.bf16.msra.mxu1 (%p728_p8), %v1513_v5 }
 0x14a   : > { %1515 = vmatprep.subr.bf16.mxu1 (%p728_p8), %v1607_v26 }
 0x194   : > { %v544_v10 = vpop.permute.xlu0 %543 }
 0x195   : > { %v546_v11 = vmul.f32 %v544_v10, %v540_v9  ;;  %v1516_v9 = vpack.c.bf16 (%p728_p8), %v845_v8, %v844_v7  ;;  %v924_v10 = vld [vmem:[%s1968_s8] sm:$0xff] (%p728_p8) }
 0x197   : > { %1280 = vmatmul.mubr.f32.vlgmr.msra.gmra.mrb[4].mxu0 %v546_v11  ;;  %1517 = vmatpush3.bf16.msra.mxu1 (%p728_p8), %v1516_v9  ;;  %v925_v11 = vld [vmem:[%s1968_s8 + $0x8] sm:$0xff] (%p728_p8) }
 0x198   : > { %1349 = vmatprep.mubr.msk.f32.mxu0 (%p728_p8), %vm1608_vm4, %v1609_v29  ;;  %1472 = vmatpush3.bf16.msra.mxu0 (%p728_p8), %v1471_v27  ;;  %v935_v27 = vld [vmem:[%s1968_s8 + $0x58] sm:$0xff] (%p728_p8) }
 0x199   : > { %1473 = vmatprep.subr.bf16.mxu0 (%p728_p8), %v1607_v26  ;;  %v1534_v28 = vpack.c.bf16 (%p728_p8), %v935_v27, %v934_v25 }
 0x19c   : > { %1475 = vmatpush3.bf16.msra.mxu0 (%p728_p8), %v1474_v30  ;;  %v937_v30 = vld [vmem:[%s1968_s8 + $0x68] sm:$0xff] (%p728_p8) }
 0x19d   : > { %1476 = vmatprep.subr.bf16.mxu0 (%p728_p8), %v1607_v26 }
 0x1a0   : > { %1478 = vmatpush3.bf16.msra.mxu0 (%p728_p8), %v1477_v37  ;;  %v938_v37 = vld [vmem:[%s1968_s8 + $0x70] sm:$0xff] (%p728_p8) }
 0x1a1   : > { %1479 = vmatprep.subr.bf16.mxu0 (%p728_p8), %v1607_v26  ;;  %v1540_v39 = vpack.c.bf16 (%p728_p8), %v939_v38, %v938_v37 }
 0x1a4   : > { %1481 = vmatpush3.bf16.msra.mxu0 (%p728_p8), %v1480_v44  ;;  %v1142_v44 = vld [vmem:[%s1969_s9] ss:$0 sm:$0xff] (%p728_p8) }
 0x1a5   : > { %1482 = vmatprep.subr.bf16.mxu0 (%p728_p8), %v1607_v26 }
 0x1a8   : > { %1484 = vmatpush3.bf16.msra.mxu0 (%p728_p8), %v1483_v50 }
 0x1a9   : > { %1485 = vmatprep.subr.bf16.mxu0 (%p728_p8), %v1607_v26 }
 0x1ac   : > { %1487 = vmatpush3.bf16.msra.mxu0 (%p728_p8), %v1486_v56 }
 0x1ad   : > { %1488 = vmatprep.subr.bf16.mxu0 (%p728_p8), %v1607_v26 }
 0x1b0   : > { %1490 = vmatpush3.bf16.msra.mxu0 (%p728_p8), %v1489_v62 }
 0x1b1   : > { %1491 = vmatprep.subr.bf16.mxu0 (%p728_p8), %v1607_v26 }
 0x1b4   : > { %1493 = vmatpush3.bf16.msra.mxu0 (%p728_p8), %v1492_v4 }
 0x1b5   : > { %1518 = vmatprep.subr.bf16.mxu0 (%p728_p8), %v1607_v26 }
 0x203   : > { %v715_v12 = vpop.f32.mrb[0].mxu1 }
 0x204   : > { %v1316_v13 = vpop.f32.mrb[1].mxu1 }
 0x205   : > { %v1519_v13 = vpack.c.bf16 (%p728_p8), %v925_v11, %v924_v10 }
 0x26a   : > { %v645_v14 = vpop.f32.mrb[4].mxu0 }
 0x26b   : > { %v716_v15 = vadd.f32 %v715_v12, %v645_v14  ;;  %v1281_v16 = vpop.f32.mrb[5].mxu0  ;;  %v926_v12 = vld [vmem:[%s1968_s8 + $0x10] sm:$0xff] (%p728_p8)  ;;  %v927_v14 = vld [vmem:[%s1968_s8 + $0x18] sm:$0xff] (%p728_p8) }
 0x26c   : > { %v928_v16 = vld [vmem:[%s1968_s8 + $0x20] sm:$0xff] (%p728_p8) }
 0x26d   : > { %v719_v17 = vmax.f32 %v716_v15, 0.0  ;;  %v1522_v15 = vpack.c.bf16 (%p728_p8), %v927_v14, %v926_v12 }
 0x26f   : > { %v720_v18 = vmul.f32 %v719_v17, %v719_v17 }
 0x271   : > { %721 = vadd.xlane.f32.xlu0 %v720_v18 }
 0x2fe   : > { %v722_v19 = vpop.xlane.xlu0 %721 }
 0x2ff   : > { %v723_v20 = vmax.f32 %v722_v19, 1e-24  ;;  %v930_v19 = vld [vmem:[%s1968_s8 + $0x30] sm:$0xff] (%p728_p8) }
 0x301   : > { %1577 = vrsqrt.f32 %v723_v20  ;;  %v931_v20 = vld [vmem:[%s1968_s8 + $0x38] sm:$0xff] (%p728_p8) }
 0x308   : > { %732 = sbr.rel (!%p728_p8) target bundleno = 1437 (0x59d), region = 88 }
 0x30b   : > { %v1578_v21 = vpop.eup %1577 }
 0x30c   : > { %v725_v22 = vmul.f32 %v1578_v21, %v719_v17  ;;  %v929_v17 = vld [vmem:[%s1968_s8 + $0x28] sm:$0xff] (%p728_p8)  ;;  %v1528_v21 = vpack.c.bf16 (%p728_p8), %v931_v20, %v930_v19 }
 0x30d   : > { %v1525_v18 = vpack.c.bf16 (%p728_p8), %v929_v17, %v928_v16 }
 0x30e   : > { %727 = vst [vmem:[#allocation3] sm:$0xff] %v725_v22  ;;  %v932_v22 = vld [vmem:[%s1968_s8 + $0x40] sm:$0xff] (%p728_p8) }
 0x30f   : > { %v1531_v24 = vpack.c.bf16 %v933_v23, %v932_v22 }
 0x315   : > { %v735_v6 = vld [vmem:[#allocation3] sm:$0xff] }
 0x316   : > { %1350 = vmatmul.mubr.f32.vlgmr.msra.gmra.mrb[0].mxu0 %v735_v6 }
 0x317   : > { %1419 = vmatprep.mubr.msk.f32.mxu0 %vm1608_vm4, %v1609_v29  ;;  %1520 = vmatpush3.bf16.msra.mxu0 %v1519_v13  ;;  %v936_v29 = vld [vmem:[%s1968_s8 + $0x60] sm:$0xff] }
 0x318   : > { %1521 = vmatprep.subr.bf16.mxu0 %v1607_v26  ;;  %v1537_v31 = vpack.c.bf16 %v937_v30, %v936_v29 }
 0x31b   : > { %1523 = vmatpush3.bf16.msra.mxu0 %v1522_v15 }
 0x31c   : > { %1524 = vmatprep.subr.bf16.mxu0 %v1607_v26 }
 0x31f   : > { %1526 = vmatpush3.bf16.msra.mxu0 %v1525_v18 }
 0x320   : > { %1527 = vmatprep.subr.bf16.mxu0 %v1607_v26 }
 0x323   : > { %1529 = vmatpush3.bf16.msra.mxu0 %v1528_v21 }
 0x324   : > { %1530 = vmatprep.subr.bf16.mxu0 %v1607_v26 }
 0x327   : > { %1532 = vmatpush3.bf16.msra.mxu0 %v1531_v24 }
 0x328   : > { %1533 = vmatprep.subr.bf16.mxu0 %v1607_v26 }
 0x32b   : > { %1535 = vmatpush3.bf16.msra.mxu0 %v1534_v28 }
 0x32c   : > { %1536 = vmatprep.subr.bf16.mxu0 %v1607_v26 }
 0x32f   : > { %1538 = vmatpush3.bf16.msra.mxu0 %v1537_v31 }
 0x330   : > { %1539 = vmatprep.subr.bf16.mxu0 %v1607_v26  ;;  %v1141_v26 = vld [vmem:[%s1967_s7] ss:$0 sm:$0xff] }
 0x333   : > { %1541 = vmatpush3.bf16.msra.mxu0 %v1540_v39 }
 0x3e9   : > { %v825_v33 = vpop.f32.mrb[0].mxu0 }
 0x3ea   : > { %v826_v34 = vadd.f32 %v1140_v32, %v825_v33  ;;  %v1351_v35 = vpop.f32.mrb[1].mxu0 }
 0x3ec   : > { %v829_v36 = vmax.f32 %v826_v34, 0.0 }
 0x3ee   : > { %1385 = vmatmul.mubr.f32.vlgmr.msra.gmra.mrb[0].mxu1 %v829_v36 }
 0x4c1   : > { %v919_v40 = vpop.f32.mrb[0].mxu1 }
 0x4c2   : > { %v920_v41 = vadd.f32 %v1141_v26, %v919_v40  ;;  %v1386_v42 = vpop.f32.mrb[1].mxu1 }
 0x4c4   : > { %v923_v43 = vmax.f32 %v920_v41, 0.0 }
 0x4c6   : > { %1420 = vmatmul.mubr.f32.vlgmr.msra.gmra.mrb[2].mxu0 %v923_v43 }
 0x599   : > { %v1013_v45 = vpop.f32.mrb[2].mxu0 }
 0x59a   : > { %v1014_v46 = vadd.f32 %v1142_v44, %v1013_v45  ;;  %v1421_v47 = vpop.f32.mrb[3].mxu0 }
 0x59c   : > { %1017 = vst [vmem:[%s1970_s10] sm:$0xff] %v1014_v46 }
 0x59d PF: > { %s20_s15 = sadd.s32 1, %s1601_s15   ;;  %s1971_s13 = smov %s1597_s14 }
 0x59e   : > { %p17_p9 = scmp.ge.s32.totalorder %s20_s15, 4   ;;  %s1972_s14 = smov %s1974_s16 }
 0x5a0   :  { %19 = sbr.rel (!%p17_p9) target bundleno = 2 (0x2), region = 130 }

</bundles_post_ra>
